<compile_context>
chip_gen: v7x
topology: tpu7x:2x2x1
jax: 0.10.0
libtpu: 0.0.40
codegen_flags: <defaults>
</compile_context>

<pallas_src>
import jax
import jax.numpy as jnp
from jax.experimental import pallas as pl
from jax.experimental.pallas import tpu as pltpu

LANE = 128  # vreg lane width


def _round_up(n, m):
    return ((n + m - 1) // m) * m


def mlp_kernel(x_ref, w1_ref, b1_ref, w2_ref, b2_ref, o_ref):
    # x_ref : (TILE_R, 128) f32 lane-dense batch tile (VMEM)
    # w1_ref, b1_ref, w2_ref : (hidden,) f32 in SMEM ; b2_ref : (1,) f32 in SMEM
    x = x_ref[...]
    hidden = w1_ref.shape[0]
    # Fold b2 and the j=0 term into the accumulator init: saves the zeros
    # materialization, one accumulate add, and the separate bias add.
    acc = jnp.maximum(x * w1_ref[0] + b1_ref[0], 0.0) * w2_ref[0] + b2_ref[0]
    for j in range(1, hidden):                               # static unroll (9)
        acc = acc + jnp.maximum(x * w1_ref[j] + b1_ref[j], 0.0) * w2_ref[j]
    o_ref[...] = acc.astype(o_ref.dtype)


def linear_regression_forward(x, w1, b1, w2, b2, *, tile_rows=2048):
    """x: (B, 1); w1: (10, 1); b1: (10,); w2: (1, 10); b2: (1,). Returns (B, 1)."""
    out_dtype = x.dtype
    B = x.shape[0]
    hidden = w1.shape[0]
    if B == 0:  # degenerate batch guard
        return jnp.zeros((0, 1), out_dtype)

    # Lane-dense slab: pad rows only up to a multiple of 8 sublanes; the row
    # tile need not divide padded_rows (Pallas masks the ragged final block).
    rows = pl.cdiv(B, LANE)
    padded_rows = _round_up(rows, 8)
    padded = padded_rows * LANE

    x_flat = x.reshape(-1).astype(jnp.float32)
    if padded == B:
        x2d = x_flat.reshape(padded_rows, LANE)          # fast path: no pad pass
    else:
        x2d = jnp.pad(x_flat, (0, padded - B)).reshape(padded_rows, LANE)

    # Row tile: large to amortize per-step overhead, but keep >=2 grid steps
    # when possible so "parallel" can shard the axis across v7x's two TCs.
    tr = min(tile_rows, padded_rows)
    if padded_rows > 8:
        tr = min(tr, _round_up(padded_rows // 2, 8))
    tr = max(8, (tr // 8) * 8)
    grid = (pl.cdiv(padded_rows, tr),)

    w1v = w1.reshape(-1).astype(jnp.float32)   # (hidden,)
    b1v = b1.reshape(-1).astype(jnp.float32)   # (hidden,)
    w2v = w2.reshape(-1).astype(jnp.float32)   # (hidden,)
    b2v = b2.reshape(-1).astype(jnp.float32)   # (1,)

    smem_spec = pl.BlockSpec(memory_space=pltpu.MemorySpace.SMEM)

    # ~5 VPU flops per hidden unit per element; 8 bytes HBM traffic per element.
    cost = pl.CostEstimate(
        flops=5 * hidden * padded,
        transcendentals=0,
        bytes_accessed=8 * padded + 4 * (3 * hidden + 1),
    )

    out2d = pl.pallas_call(
        mlp_kernel,
        out_shape=jax.ShapeDtypeStruct((padded_rows, LANE), jnp.float32),
        grid=grid,
        in_specs=[
            pl.BlockSpec((tr, LANE), lambda i: (i, 0)),   # x tile (double-buffered)
            smem_spec,                                    # w1
            smem_spec,                                    # b1
            smem_spec,                                    # w2
            smem_spec,                                    # b2
        ],
        out_specs=pl.BlockSpec((tr, LANE), lambda i: (i, 0)),
        compiler_params=pltpu.CompilerParams(
            dimension_semantics=("parallel",),            # shard batch across TCs (v7x)
        ),
        cost_estimate=cost,
    )(x2d, w1v, b1v, w2v, b2v)

    if padded == B:                                       # fast path: no slice pass
        return out2d.reshape(B, 1).astype(out_dtype)
    return out2d.reshape(-1)[:B].reshape(B, 1).astype(out_dtype)


def _torch_like_ref(x, w1, b1, w2, b2):
    # PyTorch convention: y = x @ W.T + b
    return jnp.maximum(x @ w1.T + b1, 0.0) @ w2.T + b2


if __name__ == "__main__":
    key = jax.random.PRNGKey(0)
    k_x, k_w1, k_b1, k_w2, k_b2, k_x2 = jax.random.split(key, 6)

    in_f, hidden, out_f = 1, 10, 1

    # Deterministic parameter init (PyTorch-style uniform bounds 1/sqrt(fan_in)).
    w1 = jax.random.uniform(k_w1, (hidden, in_f), minval=-1.0, maxval=1.0,
                            dtype=jnp.float32)               # fan_in=1 -> bound 1
    b1 = jax.random.uniform(k_b1, (hidden,), minval=-1.0, maxval=1.0,
                            dtype=jnp.float32)
    bound2 = 1.0 / jnp.sqrt(float(hidden))
    w2 = jax.random.uniform(k_w2, (out_f, hidden), minval=-bound2, maxval=bound2,
                            dtype=jnp.float32)
    b2 = jax.random.uniform(k_b2, (out_f,), minval=-bound2, maxval=bound2,
                            dtype=jnp.float32)

    # Case 1: ragged batch (exercises the pad + masked-final-block path).
    batch = 300
    x = jax.random.normal(k_x, (batch, in_f), dtype=jnp.float32)
    out = jax.block_until_ready(linear_regression_forward(x, w1, b1, w2, b2))
    ref = _torch_like_ref(x, w1, b1, w2, b2)
    assert out.shape == (batch, out_f)
    assert jnp.allclose(out, ref, atol=1e-5, rtol=1e-5)

    # Case 2: slab-aligned batch (exercises the no-pad fast path + 2-step grid).
    batch2 = 2048
    x2 = jax.random.normal(k_x2, (batch2, in_f), dtype=jnp.float32)
    out2 = jax.block_until_ready(linear_regression_forward(x2, w1, b1, w2, b2))
    ref2 = _torch_like_ref(x2, w1, b1, w2, b2)
    assert out2.shape == (batch2, out_f)
    assert jnp.allclose(out2, ref2, atol=1e-5, rtol=1e-5)

    print("KERNEL_OK")
</pallas_src>

<mosaic_0001>
module attributes {stable_mosaic.version = 11 : i64} {
  func.func @mlp_kernel(%arg0: i32, %arg1: memref<8x128xf32, #tpu.memory_space<vmem>>, %arg2: memref<10xf32, #tpu.memory_space<smem>>, %arg3: memref<10xf32, #tpu.memory_space<smem>>, %arg4: memref<10xf32, #tpu.memory_space<smem>>, %arg5: memref<1xf32, #tpu.memory_space<smem>>, %arg6: memref<8x128xf32, #tpu.memory_space<vmem>>) attributes {dimension_semantics = [#tpu.dimension_semantics<parallel>], iteration_bounds = array<i64: 1>, scalar_prefetch = 0 : i64, scratch_operands = 0 : i64, tpu.core_type = #tpu.core_type<tc>, window_params = [{transform_indices = @transform_0, window_bounds = array<i64: 8, 128>}, {transform_indices = @transform_1, window_bounds = array<i64: 10>}, {transform_indices = @transform_2, window_bounds = array<i64: 10>}, {transform_indices = @transform_3, window_bounds = array<i64: 10>}, {transform_indices = @transform_4, window_bounds = array<i64: 1>}, {transform_indices = @transform_5, window_bounds = array<i64: 8, 128>}]} {
    %c0 = arith.constant 0 : index
    %c0_0 = arith.constant 0 : index
    %0 = vector.load %arg1[%c0, %c0_0] : memref<8x128xf32, #tpu.memory_space<vmem>>, vector<8x128xf32>
    %c0_1 = arith.constant 0 : index
    %1 = memref.load %arg2[%c0_1] : memref<10xf32, #tpu.memory_space<smem>>
    %2 = vector.broadcast %1 : f32 to vector<8x128xf32>
    %3 = arith.mulf %0, %2 : vector<8x128xf32>
    %c0_2 = arith.constant 0 : index
    %4 = memref.load %arg3[%c0_2] : memref<10xf32, #tpu.memory_space<smem>>
    %5 = vector.broadcast %4 : f32 to vector<8x128xf32>
    %6 = arith.addf %3, %5 : vector<8x128xf32>
    %cst = arith.constant 0.000000e+00 : f32
    %7 = vector.broadcast %cst : f32 to vector<8x128xf32>
    %8 = arith.maximumf %6, %7 : vector<8x128xf32>
    %c0_3 = arith.constant 0 : index
    %9 = memref.load %arg4[%c0_3] : memref<10xf32, #tpu.memory_space<smem>>
    %10 = vector.broadcast %9 : f32 to vector<8x128xf32>
    %11 = arith.mulf %8, %10 : vector<8x128xf32>
    %c0_4 = arith.constant 0 : index
    %12 = memref.load %arg5[%c0_4] : memref<1xf32, #tpu.memory_space<smem>>
    %13 = vector.broadcast %12 : f32 to vector<8x128xf32>
    %14 = arith.addf %11, %13 : vector<8x128xf32>
    %c1 = arith.constant 1 : index
    %15 = memref.load %arg2[%c1] : memref<10xf32, #tpu.memory_space<smem>>
    %16 = vector.broadcast %15 : f32 to vector<8x128xf32>
    %17 = arith.mulf %0, %16 : vector<8x128xf32>
    %c1_5 = arith.constant 1 : index
    %18 = memref.load %arg3[%c1_5] : memref<10xf32, #tpu.memory_space<smem>>
    %19 = vector.broadcast %18 : f32 to vector<8x128xf32>
    %20 = arith.addf %17, %19 : vector<8x128xf32>
    %cst_6 = arith.constant 0.000000e+00 : f32
    %21 = vector.broadcast %cst_6 : f32 to vector<8x128xf32>
    %22 = arith.maximumf %20, %21 : vector<8x128xf32>
    %c1_7 = arith.constant 1 : index
    %23 = memref.load %arg4[%c1_7] : memref<10xf32, #tpu.memory_space<smem>>
    %24 = vector.broadcast %23 : f32 to vector<8x128xf32>
    %25 = arith.mulf %22, %24 : vector<8x128xf32>
    %26 = arith.addf %14, %25 : vector<8x128xf32>
    %c2 = arith.constant 2 : index
    %27 = memref.load %arg2[%c2] : memref<10xf32, #tpu.memory_space<smem>>
    %28 = vector.broadcast %27 : f32 to vector<8x128xf32>
    %29 = arith.mulf %0, %28 : vector<8x128xf32>
    %c2_8 = arith.constant 2 : index
    %30 = memref.load %arg3[%c2_8] : memref<10xf32, #tpu.memory_space<smem>>
    %31 = vector.broadcast %30 : f32 to vector<8x128xf32>
    %32 = arith.addf %29, %31 : vector<8x128xf32>
    %cst_9 = arith.constant 0.000000e+00 : f32
    %33 = vector.broadcast %cst_9 : f32 to vector<8x128xf32>
    %34 = arith.maximumf %32, %33 : vector<8x128xf32>
    %c2_10 = arith.constant 2 : index
    %35 = memref.load %arg4[%c2_10] : memref<10xf32, #tpu.memory_space<smem>>
    %36 = vector.broadcast %35 : f32 to vector<8x128xf32>
    %37 = arith.mulf %34, %36 : vector<8x128xf32>
    %38 = arith.addf %26, %37 : vector<8x128xf32>
    %c3 = arith.constant 3 : index
    %39 = memref.load %arg2[%c3] : memref<10xf32, #tpu.memory_space<smem>>
    %40 = vector.broadcast %39 : f32 to vector<8x128xf32>
    %41 = arith.mulf %0, %40 : vector<8x128xf32>
    %c3_11 = arith.constant 3 : index
    %42 = memref.load %arg3[%c3_11] : memref<10xf32, #tpu.memory_space<smem>>
    %43 = vector.broadcast %42 : f32 to vector<8x128xf32>
    %44 = arith.addf %41, %43 : vector<8x128xf32>
    %cst_12 = arith.constant 0.000000e+00 : f32
    %45 = vector.broadcast %cst_12 : f32 to vector<8x128xf32>
    %46 = arith.maximumf %44, %45 : vector<8x128xf32>
    %c3_13 = arith.constant 3 : index
    %47 = memref.load %arg4[%c3_13] : memref<10xf32, #tpu.memory_space<smem>>
    %48 = vector.broadcast %47 : f32 to vector<8x128xf32>
    %49 = arith.mulf %46, %48 : vector<8x128xf32>
    %50 = arith.addf %38, %49 : vector<8x128xf32>
    %c4 = arith.constant 4 : index
    %51 = memref.load %arg2[%c4] : memref<10xf32, #tpu.memory_space<smem>>
    %52 = vector.broadcast %51 : f32 to vector<8x128xf32>
    %53 = arith.mulf %0, %52 : vector<8x128xf32>
    %c4_14 = arith.constant 4 : index
    %54 = memref.load %arg3[%c4_14] : memref<10xf32, #tpu.memory_space<smem>>
    %55 = vector.broadcast %54 : f32 to vector<8x128xf32>
    %56 = arith.addf %53, %55 : vector<8x128xf32>
    %cst_15 = arith.constant 0.000000e+00 : f32
    %57 = vector.broadcast %cst_15 : f32 to vector<8x128xf32>
    %58 = arith.maximumf %56, %57 : vector<8x128xf32>
    %c4_16 = arith.constant 4 : index
    %59 = memref.load %arg4[%c4_16] : memref<10xf32, #tpu.memory_space<smem>>
    %60 = vector.broadcast %59 : f32 to vector<8x128xf32>
    %61 = arith.mulf %58, %60 : vector<8x128xf32>
    %62 = arith.addf %50, %61 : vector<8x128xf32>
    %c5 = arith.constant 5 : index
    %63 = memref.load %arg2[%c5] : memref<10xf32, #tpu.memory_space<smem>>
    %64 = vector.broadcast %63 : f32 to vector<8x128xf32>
    %65 = arith.mulf %0, %64 : vector<8x128xf32>
    %c5_17 = arith.constant 5 : index
    %66 = memref.load %arg3[%c5_17] : memref<10xf32, #tpu.memory_space<smem>>
    %67 = vector.broadcast %66 : f32 to vector<8x128xf32>
    %68 = arith.addf %65, %67 : vector<8x128xf32>
    %cst_18 = arith.constant 0.000000e+00 : f32
    %69 = vector.broadcast %cst_18 : f32 to vector<8x128xf32>
    %70 = arith.maximumf %68, %69 : vector<8x128xf32>
    %c5_19 = arith.constant 5 : index
    %71 = memref.load %arg4[%c5_19] : memref<10xf32, #tpu.memory_space<smem>>
    %72 = vector.broadcast %71 : f32 to vector<8x128xf32>
    %73 = arith.mulf %70, %72 : vector<8x128xf32>
    %74 = arith.addf %62, %73 : vector<8x128xf32>
    %c6 = arith.constant 6 : index
    %75 = memref.load %arg2[%c6] : memref<10xf32, #tpu.memory_space<smem>>
    %76 = vector.broadcast %75 : f32 to vector<8x128xf32>
    %77 = arith.mulf %0, %76 : vector<8x128xf32>
    %c6_20 = arith.constant 6 : index
    %78 = memref.load %arg3[%c6_20] : memref<10xf32, #tpu.memory_space<smem>>
    %79 = vector.broadcast %78 : f32 to vector<8x128xf32>
    %80 = arith.addf %77, %79 : vector<8x128xf32>
    %cst_21 = arith.constant 0.000000e+00 : f32
    %81 = vector.broadcast %cst_21 : f32 to vector<8x128xf32>
    %82 = arith.maximumf %80, %81 : vector<8x128xf32>
    %c6_22 = arith.constant 6 : index
    %83 = memref.load %arg4[%c6_22] : memref<10xf32, #tpu.memory_space<smem>>
    %84 = vector.broadcast %83 : f32 to vector<8x128xf32>
    %85 = arith.mulf %82, %84 : vector<8x128xf32>
    %86 = arith.addf %74, %85 : vector<8x128xf32>
    %c7 = arith.constant 7 : index
    %87 = memref.load %arg2[%c7] : memref<10xf32, #tpu.memory_space<smem>>
    %88 = vector.broadcast %87 : f32 to vector<8x128xf32>
    %89 = arith.mulf %0, %88 : vector<8x128xf32>
    %c7_23 = arith.constant 7 : index
    %90 = memref.load %arg3[%c7_23] : memref<10xf32, #tpu.memory_space<smem>>
    %91 = vector.broadcast %90 : f32 to vector<8x128xf32>
    %92 = arith.addf %89, %91 : vector<8x128xf32>
    %cst_24 = arith.constant 0.000000e+00 : f32
    %93 = vector.broadcast %cst_24 : f32 to vector<8x128xf32>
    %94 = arith.maximumf %92, %93 : vector<8x128xf32>
    %c7_25 = arith.constant 7 : index
    %95 = memref.load %arg4[%c7_25] : memref<10xf32, #tpu.memory_space<smem>>
    %96 = vector.broadcast %95 : f32 to vector<8x128xf32>
    %97 = arith.mulf %94, %96 : vector<8x128xf32>
    %98 = arith.addf %86, %97 : vector<8x128xf32>
    %c8 = arith.constant 8 : index
    %99 = memref.load %arg2[%c8] : memref<10xf32, #tpu.memory_space<smem>>
    %100 = vector.broadcast %99 : f32 to vector<8x128xf32>
    %101 = arith.mulf %0, %100 : vector<8x128xf32>
    %c8_26 = arith.constant 8 : index
    %102 = memref.load %arg3[%c8_26] : memref<10xf32, #tpu.memory_space<smem>>
    %103 = vector.broadcast %102 : f32 to vector<8x128xf32>
    %104 = arith.addf %101, %103 : vector<8x128xf32>
    %cst_27 = arith.constant 0.000000e+00 : f32
    %105 = vector.broadcast %cst_27 : f32 to vector<8x128xf32>
    %106 = arith.maximumf %104, %105 : vector<8x128xf32>
    %c8_28 = arith.constant 8 : index
    %107 = memref.load %arg4[%c8_28] : memref<10xf32, #tpu.memory_space<smem>>
    %108 = vector.broadcast %107 : f32 to vector<8x128xf32>
    %109 = arith.mulf %106, %108 : vector<8x128xf32>
    %110 = arith.addf %98, %109 : vector<8x128xf32>
    %c9 = arith.constant 9 : index
    %111 = memref.load %arg2[%c9] : memref<10xf32, #tpu.memory_space<smem>>
    %112 = vector.broadcast %111 : f32 to vector<8x128xf32>
    %113 = arith.mulf %0, %112 : vector<8x128xf32>
    %c9_29 = arith.constant 9 : index
    %114 = memref.load %arg3[%c9_29] : memref<10xf32, #tpu.memory_space<smem>>
    %115 = vector.broadcast %114 : f32 to vector<8x128xf32>
    %116 = arith.addf %113, %115 : vector<8x128xf32>
    %cst_30 = arith.constant 0.000000e+00 : f32
    %117 = vector.broadcast %cst_30 : f32 to vector<8x128xf32>
    %118 = arith.maximumf %116, %117 : vector<8x128xf32>
    %c9_31 = arith.constant 9 : index
    %119 = memref.load %arg4[%c9_31] : memref<10xf32, #tpu.memory_space<smem>>
    %120 = vector.broadcast %119 : f32 to vector<8x128xf32>
    %121 = arith.mulf %118, %120 : vector<8x128xf32>
    %122 = arith.addf %110, %121 : vector<8x128xf32>
    %c0_32 = arith.constant 0 : index
    %c0_33 = arith.constant 0 : index
    %123 = vector.load %arg6[%c0_32, %c0_33] : memref<8x128xf32, #tpu.memory_space<vmem>>, vector<8x128xf32>
    tpu.vector_store %arg6[%c0_32, %c0_33], %122 {strides = array<i32>} : memref<8x128xf32, #tpu.memory_space<vmem>>, vector<8x128xf32>,
    return
  }
  func.func @transform_0(%arg0: i32) -> (i32, i32) {
    %c0_i32 = arith.constant 0 : i32
    %c0_i32_0 = arith.constant 0 : i32
    return %arg0, %c0_i32 : i32, i32
  }
  func.func @transform_1(%arg0: i32) -> i32 {
    %c0_i32 = arith.constant 0 : i32
    %c0_i32_0 = arith.constant 0 : i32
    return %c0_i32 : i32
  }
  func.func @transform_2(%arg0: i32) -> i32 {
    %c0_i32 = arith.constant 0 : i32
    %c0_i32_0 = arith.constant 0 : i32
    return %c0_i32 : i32
  }
  func.func @transform_3(%arg0: i32) -> i32 {
    %c0_i32 = arith.constant 0 : i32
    %c0_i32_0 = arith.constant 0 : i32
    return %c0_i32 : i32
  }
  func.func @transform_4(%arg0: i32) -> i32 {
    %c0_i32 = arith.constant 0 : i32
    %c0_i32_0 = arith.constant 0 : i32
    return %c0_i32 : i32
  }
  func.func @transform_5(%arg0: i32) -> (i32, i32) {
    %c0_i32 = arith.constant 0 : i32
    %c0_i32_0 = arith.constant 0 : i32
    return %arg0, %c0_i32 : i32, i32
  }
}

</mosaic_0001>

<bundles_post_ra>
// kernel: tpu_custom_call.1
= control target key start
LH: loop header
LB: loop body
LE: loop exit
PB: predicated region body
PF: predicated region fallthrough
CT: control target
= control target key end

     0   :  { %11 = vsyncpa [#allocation4], 0  ;;  %s476_s0 = inlined_call_operand.hbm [shape: f32[8,128], index: 0, kind: input, shape index: {}]   ;;  %s477_s1 = inlined_call_operand.vmem [shape: f32[10], index: 1, kind: input, shape index: {}]   ;;  %s478_s2 = inlined_call_operand.vmem [shape: f32[10], index: 2, kind: input, shape index: {}]   ;;  %s479_s3 = inlined_call_operand.vmem [shape: f32[10], index: 3, kind: input, shape index: {}]   ;;  %s480_s4 = inlined_call_operand.<no memory space> [shape: f32[1], index: 4, kind: input, shape index: {}]   ;;  %s481_s5 = inlined_call_operand.hbm [shape: f32[8,128], index: 5, kind: output, shape index: {}]  }
   0x1   :  { %12 = vsyncpa [#allocation6], 0 }
   0x2   :  { %13 = vsyncpa [#allocation9], 0  ;;  %s41_s20 = sshll.u32 %s478_s2, 4  ;;  %s42_s20 = int_to_ptr.vmem [resolvable:$true] %s41_s20 }
   0x3   :  { %14 = vsyncpa [#allocation5], 0  ;;  %s233_s21 = scalar_lea.vmem %s42_s20, 16  ;;  %p238_p1 = scmp.lt.s32.totalorder %s42_s20, %s42_s20 }
   0x4   :  { %p234_p0 = scmp.ne.s32.totalorder %s42_s20, %s233_s21  ;;  %p239_p2 = scmp.lt.s32.totalorder %s233_s21, %s233_s21 }
   0x6   :  { %p240_p3 = por %p239_p2, %p238_p1 }
   0x8   :  { %p241_p4 = pnand %p240_p3, %p234_p0 }
   0xa   :  { %244 = shalt.err (!%p241_p4)
}
   0xb   :  { %s321_s22 = smov [#allocation8]   ;;  %s322_s23 = smov [#allocation3]  }
   0xc   :  { %44 = dma.vmem_to_smem %s42_s20, 16, %s321_s22, [#allocation9]  }
   0xd   :  { %s21_s24 = sshll.u32 %s322_s23, 4  ;;  %s31_s27 = sshll.u32 %s477_s1, 4  ;;  %s22_s24 = int_to_ptr.vmem [resolvable:$true] %s21_s24  ;;  %s32_s27 = int_to_ptr.vmem [resolvable:$true] %s31_s27 }
   0xe   :  { %s245_s29 = scalar_lea.hbm %s476_s0, 128 }
   0xf   :  { %p246_p5 = scmp.ne.s32.totalorder %s476_s0, %s245_s29  ;;  %p249_p6 = scmp.lt.u32.totalorder %s245_s29, %s476_s0 }
  0x11   :  { %p251_p7 = pnand %p249_p6, %p246_p5 }
  0x13   :  { %254 = shalt.err (!%p251_p7)
}
  0x14   :  { %s255_s9 = scalar_lea.vmem %s22_s24, 128  ;;  %p260_p9 = scmp.lt.s32.totalorder %s22_s24, %s22_s24 }
  0x15   :  { %p256_p8 = scmp.ne.s32.totalorder %s22_s24, %s255_s9  ;;  %p261_p10 = scmp.lt.s32.totalorder %s255_s9, %s255_s9 }
  0x17   :  { %p262_p11 = por %p261_p10, %p260_p9 }
  0x19   :  { %p263_p12 = pnand %p262_p11, %p256_p8 }
  0x1b   :  { %266 = shalt.err (!%p263_p12)
}
  0x1c   :  { %24 = dma.hbm_to_vmem [thread:$0]  %s476_s0, 128, %s22_s24, [#allocation4]  }
  0x1d   :  { %s51_s13 = sshll.u32 %s479_s3, 4  ;;  %s267_s14 = scalar_lea.vmem %s32_s27, 16  ;;  %s52_s13 = int_to_ptr.vmem [resolvable:$true] %s51_s13 }
  0x1e   :  { %p268_p13 = scmp.ne.s32.totalorder %s32_s27, %s267_s14  ;;  %p272_p0 = scmp.lt.s32.totalorder %s32_s27, %s32_s27 }
  0x1f   :  { %p273_p1 = scmp.lt.s32.totalorder %s267_s14, %s267_s14 }
  0x21   :  { %p274_p2 = por %p273_p1, %p272_p0 }
  0x23   :  { %p275_p3 = pnand %p274_p2, %p268_p13 }
  0x25   :  { %278 = shalt.err (!%p275_p3)
}
  0x26   :  { %s323_s15 = smov [#allocation7]   ;;  %s279_s16 = scalar_lea.vmem %s52_s13, 16 }
  0x27   :  { %34 = dma.vmem_to_smem %s32_s27, 16, %s323_s15, [#allocation6]  }
  0x28   :  { %p280_p4 = scmp.ne.s32.totalorder %s52_s13, %s279_s16  ;;  %p284_p5 = scmp.lt.s32.totalorder %s52_s13, %s52_s13 }
  0x29   :  { %p285_p6 = scmp.lt.s32.totalorder %s279_s16, %s279_s16 }
  0x2b   :  { %p286_p7 = por %p285_p6, %p284_p5 }
  0x2d   :  { %p287_p8 = pnand %p286_p7, %p280_p4 }
  0x2f   :  { %290 = shalt.err (!%p287_p8)
}
  0x30   :  { %s324_s0 = smov [#allocation10]  }
  0x31   :  { %54 = dma.vmem_to_smem %s52_s13, 16, %s324_s0, [#allocation9]  }
  0x32   :  { %313 = dma.done.wait [#allocation4], 128  }
  0x33   :  { %314 = vsyncadd [#allocation4], 4294967168 }
  0x34   :  { %315 = dma.done.wait [#allocation6], 16  }
  0x35   :  { %316 = vsyncadd [#allocation6], 4294967280 }
  0x36   :  { %317 = dma.done.wait [#allocation9], 32  }
  0x37   :  { %318 = vsyncadd [#allocation9], 4294967264 }
  0x38   :  { %69 = sfence }
  0x39   :  { %s71_s3 = sld [smem:[#allocation7]]  ;;  %s201_s19 = sld [smem:[#allocation7 + $0x1]]  ;;  %v383_v0 = vld [vmem:[#allocation3] sm:$0xff]  ;;  %v82_v5 = vstv %s480_s4 }
  0x3a   :  { %s74_s17 = sld [smem:[#allocation8]]  ;;  %s202_s20 = sld [smem:[#allocation8 + $0x1]] }
  0x3b   :  { %s377_s18 = sld [smem:[#allocation10]]  ;;  %s379_s21 = sld [smem:[#allocation10 + $0x1]] }
  0x3c   :  { %s204_s22 = sld [smem:[#allocation7 + $0x2]]  ;;  %s207_s25 = sld [smem:[#allocation7 + $0x3]] }
  0x3d   :  { %s381_s23 = sld [smem:[#allocation8 + $0x2]]  ;;  %s387_s26 = sld [smem:[#allocation8 + $0x3]] }
  0x3e   :  { %s385_s24 = sld [smem:[#allocation10 + $0x2]]  ;;  %s389_s27 = sld [smem:[#allocation10 + $0x3]] }
  0x3f   :  { %v72_v1 = vstv %s71_s3  ;;  %s391_s2 = sld [smem:[#allocation7 + $0x4]]  ;;  %v85_v4 = vstv %s201_s19  ;;  %s396_s29 = sld [smem:[#allocation7 + $0x5]] }
  0x40   :  { %v75_v2 = vstv %s74_s17  ;;  %s393_s28 = sld [smem:[#allocation8 + $0x4]]  ;;  %v73_v3 = vmul.f32 %v72_v1, %v383_v0  ;;  %v86_v6 = vmul.f32 %v85_v4, %v383_v0  ;;  %v88_v7 = vstv %s202_s20  ;;  %s404_s8 = sld [smem:[#allocation8 + $0x5]] }
  0x41   :  { %s402_s7 = sld [smem:[#allocation10 + $0x4]]  ;;  %v79_v9 = vstv %s377_s18  ;;  %s408_s9 = sld [smem:[#allocation7 + $0x6]]  ;;  %v92_v13 = vstv %s379_s21 }
  0x42   :  { %v76_v8 = vadd.f32 %v75_v2, %v73_v3  ;;  %v96_v10 = vstv %s204_s22  ;;  %s410_s1 = sld [smem:[#allocation8 + $0x6]]  ;;  %v89_v12 = vadd.f32 %v88_v7, %v86_v6  ;;  %v107_v15 = vstv %s207_s25  ;;  %s414_s4 = sld [smem:[#allocation10 + $0x5]] }
  0x43   :  { %v99_v11 = vstv %s381_s23  ;;  %v97_v14 = vmul.f32 %v96_v10, %v383_v0  ;;  %s416_s10 = sld [smem:[#allocation7 + $0x7]]  ;;  %v108_v18 = vmul.f32 %v107_v15, %v383_v0  ;;  %v110_v19 = vstv %s387_s26  ;;  %s421_s11 = sld [smem:[#allocation10 + $0x6]] }
  0x44   :  { %v77_v16 = vmax.f32 %v76_v8, 0.0  ;;  %v103_v17 = vstv %s385_s24  ;;  %s423_s12 = sld [smem:[#allocation8 + $0x7]]  ;;  %v90_v20 = vmax.f32 %v89_v12, 0.0  ;;  %s427_s13 = sld [smem:[#allocation7 + $0x8]]  ;;  %v114_v26 = vstv %s389_s27 }
  0x45   :  { %v100_v21 = vadd.f32 %v99_v11, %v97_v14  ;;  %v118_v22 = vstv %s391_s2  ;;  %s429_s14 = sld [smem:[#allocation8 + $0x8]]  ;;  %v111_v25 = vadd.f32 %v110_v19, %v108_v18  ;;  %s433_s15 = sld [smem:[#allocation10 + $0x7]]  ;;  %v129_v30 = vstv %s396_s29 }
  0x46   :  { %v121_v23 = vstv %s393_s28  ;;  %v80_v24 = vmul.f32 %v79_v9, %v77_v16  ;;  %v119_v27 = vmul.f32 %v118_v22, %v383_v0  ;;  %v93_v28 = vmul.f32 %v92_v13, %v90_v20  ;;  %s437_s16 = sld [smem:[#allocation7 + $0x9]]  ;;  %s445_s3 = sld [smem:[#allocation10 + $0x8]] }
  0x47   :  { %v101_v29 = vmax.f32 %v100_v21, 0.0  ;;  %v132_v31 = vstv %s404_s8  ;;  %s439_s0 = sld [smem:[#allocation8 + $0x9]]  ;;  %v112_v33 = vmax.f32 %v111_v25, 0.0  ;;  %v130_v35 = vmul.f32 %v129_v30, %v383_v0  ;;  %s325_s18 = smov [#allocation11]  }
  0x48   :  { %v83_v32 = vadd.f32 %v82_v5, %v80_v24  ;;  %v122_v34 = vadd.f32 %v121_v23, %v119_v27  ;;  %v125_v37 = vstv %s402_s7  ;;  %v140_v38 = vstv %s408_s9  ;;  %s451_s17 = sld [smem:[#allocation10 + $0x9]]  ;;  %s190_s19 = sshll.u32 %s325_s18, 4  ;;  %s191_s19 = int_to_ptr.vmem [resolvable:$true] %s190_s19 }
  0x49   :  { %v104_v36 = vmul.f32 %v103_v17, %v101_v29  ;;  %v143_v39 = vstv %s410_s1  ;;  %v115_v41 = vmul.f32 %v114_v26, %v112_v33  ;;  %v133_v43 = vadd.f32 %v132_v31, %v130_v35  ;;  %s291_s20 = scalar_lea.vmem %s191_s19, 128  ;;  %p296_p10 = scmp.lt.s32.totalorder %s191_s19, %s191_s19 }
  0x4a   :  { %v94_v40 = vadd.f32 %v93_v28, %v83_v32  ;;  %v123_v42 = vmax.f32 %v122_v34, 0.0  ;;  %v136_v44 = vstv %s414_s4  ;;  %v141_v45 = vmul.f32 %v140_v38, %v383_v0  ;;  %p292_p9 = scmp.ne.s32.totalorder %s191_s19, %s291_s20  ;;  %p297_p11 = scmp.lt.s32.totalorder %s291_s20, %s291_s20 }
  0x4b   :  { %v151_v46 = vstv %s416_s10  ;;  %v154_v47 = vstv %s423_s12  ;;  %v134_v50 = vmax.f32 %v133_v43, 0.0  ;;  %v147_v53 = vstv %s421_s11 }
  0x4c   :  { %v105_v48 = vadd.f32 %v104_v36, %v94_v40  ;;  %v126_v49 = vmul.f32 %v125_v37, %v123_v42  ;;  %v152_v51 = vmul.f32 %v151_v46, %v383_v0  ;;  %v144_v52 = vadd.f32 %v143_v39, %v141_v45  ;;  %p298_p12 = por %p297_p11, %p296_p10 }
  0x4d   :  { %v162_v54 = vstv %s427_s13  ;;  %v165_v55 = vstv %s429_s14  ;;  %v137_v57 = vmul.f32 %v136_v44, %v134_v50  ;;  %v158_v61 = vstv %s433_s15 }
  0x4e   :  { %v116_v56 = vadd.f32 %v115_v41, %v105_v48  ;;  %v155_v58 = vadd.f32 %v154_v47, %v152_v51  ;;  %v163_v59 = vmul.f32 %v162_v54, %v383_v0  ;;  %v145_v60 = vmax.f32 %v144_v52, 0.0  ;;  %p299_p13 = pnand %p298_p12, %p292_p9 }
  0x4f   :  { %v173_v62 = vstv %s437_s16  ;;  %v176_v63 = vstv %s439_s0  ;;  %v169_v6 = vstv %s445_s3  ;;  %v180_v11 = vstv %s451_s17 }
  0x50   :  { %v127_v1 = vadd.f32 %v126_v49, %v116_v56  ;;  %v156_v2 = vmax.f32 %v155_v58, 0.0  ;;  %v166_v3 = vadd.f32 %v165_v55, %v163_v59  ;;  %v174_v4 = vmul.f32 %v173_v62, %v383_v0 }
  0x51   :  { %v148_v5 = vmul.f32 %v147_v53, %v145_v60 }
  0x52   :  { %v138_v7 = vadd.f32 %v137_v57, %v127_v1  ;;  %v159_v8 = vmul.f32 %v158_v61, %v156_v2  ;;  %v167_v9 = vmax.f32 %v166_v3, 0.0  ;;  %v177_v10 = vadd.f32 %v176_v63, %v174_v4 }
  0x54   :  { %v149_v12 = vadd.f32 %v148_v5, %v138_v7  ;;  %v170_v13 = vmul.f32 %v169_v6, %v167_v9  ;;  %v178_v14 = vmax.f32 %v177_v10, 0.0 }
  0x56   :  { %v160_v15 = vadd.f32 %v159_v8, %v149_v12  ;;  %v181_v16 = vmul.f32 %v180_v11, %v178_v14 }
  0x58   :  { %v171_v17 = vadd.f32 %v170_v13, %v160_v15 }
  0x5a   :  { %v182_v18 = vadd.f32 %v181_v16, %v171_v17 }
  0x5c   :  { %183 = vst [vmem:[#allocation11] sm:$0xff] %v182_v18 }
  0x5d   :  { %302 = shalt.err (!%p299_p13)
}
  0x5e   :  { %s303_s23 = scalar_lea.hbm %s481_s5, 128 }
  0x5f   :  { %p304_p0 = scmp.ne.s32.totalorder %s481_s5, %s303_s23  ;;  %p307_p1 = scmp.lt.u32.totalorder %s303_s23, %s481_s5 }
  0x61   :  { %p309_p2 = pnand %p307_p1, %p304_p0 }
  0x63   :  { %312 = shalt.err (!%p309_p2)
}
  0x64   :  { %193 = dma.vmem_to_hbm [thread:$0]  %s191_s19, 128, %s481_s5, [#allocation5]  }
  0x65   :  { %319 = dma.done.wait [#allocation5], 128  }
  0x66   :  { %320 = vsyncadd [#allocation5], 4294967168 }
  0x67   :  { %197 = vsyncpa [#allocation4], 1 }
  0x68   :  { %198 = vsyncpa [#allocation5], 1 }
  0x69   :  { %199 = vsyncpa [#allocation6], 1 }
  0x6a   :  { %200 = vsyncpa [#allocation9], 1 }

</bundles_post_ra>
